<compile_context>
chip_gen: v6e
topology: v6e:2x2x1
jax: 0.10.0
libtpu: 0.0.40
codegen_flags: <defaults>
</compile_context>

<pallas_src>
import functools

import jax
import jax.numpy as jnp
from jax import lax
from jax.experimental import pallas as pl
from jax.experimental.pallas import tpu as pltpu


def _round_up(a, b):
    return (a + b - 1) // b * b


# --------------------------------- kernels --------------------------------- #

def _epilogue(y, yi, idn, mode, ox_ref, oi_ref):
    """y: x-stream pre-activation (norm scale already folded into the weights),
    yi: init-stream pre-activation, idn: identity (+ folded norm bias)."""
    y = y + idn
    if mode == 0:
        ox = jnp.maximum(y, 0.0)                       # relu(conv(x) + identity)
    else:                                              # modes 1/2/3: sign-gated by init stream
        ox = y * (yi > 0.0).astype(y.dtype)
    ox_ref[...] = ox.astype(ox_ref.dtype)
    oi_ref[...] = jnp.maximum(yi, 0.0).astype(oi_ref.dtype)


def _shared_patch_kernel(p_ref, w_ref, id_ref, ox_ref, oi_ref, *, mode, cop, shared_w):
    """x_init shares x's patches: one (TM,Kp) @ (Kp, Cop or 2*Cop) matmul."""
    yy = jnp.dot(p_ref[...], w_ref[...], preferred_element_type=jnp.float32)
    if shared_w:
        y, yi = yy, yy                                 # conv_init is a clone of conv
    else:
        y, yi = yy[:, :cop], yy[:, cop:]               # lane-aligned 128-boundary split
    _epilogue(y, yi, id_ref[...], mode, ox_ref, oi_ref)


def _two_patch_kernel(px_ref, pi_ref, w_ref, wi_ref, id_ref, ox_ref, oi_ref, *, mode):
    """Distinct x_init: two (TM,Kp) @ (Kp,Cop) matmuls."""
    y = jnp.dot(px_ref[...], w_ref[...], preferred_element_type=jnp.float32)
    yi = jnp.dot(pi_ref[...], wi_ref[...], preferred_element_type=jnp.float32)
    _epilogue(y, yi, id_ref[...], mode, ox_ref, oi_ref)


# --------------------------------- wrapper --------------------------------- #

def _im2col(x, k, p):
    """x: (N,C,H,W) -> patches (N*Ho*Wo, C*k*k), flattened in (c, kh, kw) order
    to exactly match PyTorch's OIHW weight .reshape(Co, -1)."""
    N, C, H, W = x.shape
    xp = jnp.pad(x, ((0, 0), (0, 0), (p, p), (p, p)))
    Ho = H + 2 * p - k + 1
    Wo = W + 2 * p - k + 1
    cols = [xp[:, :, u:u + Ho, v:v + Wo] for u in range(k) for v in range(k)]
    pat = jnp.stack(cols, axis=0).reshape(k, k, N, C, Ho, Wo)
    pat = pat.transpose(2, 4, 5, 3, 0, 1)              # (N, Ho, Wo, C, kh, kw)
    return pat.reshape(N * Ho * Wo, C * k * k), Ho, Wo


@functools.partial(
    jax.jit,
    static_argnames=("padding", "mode", "tm", "shared_patches", "shared_weights"))
def _forward(x, x_init, w, w_init, identity, norm_scale, norm_bias, *,
             padding, mode, tm, shared_patches, shared_weights):
    compute_dtype = jnp.bfloat16                       # 2x MXU rate + half the DMA bytes
    N, C, H, W = x.shape
    Co, Ci, k, _ = w.shape
    assert Ci == C

    # Fold the (inference-mode) norm affine into the conv weight / identity.
    w_eff = w if norm_scale is None else w * norm_scale.reshape(Co, 1, 1, 1)
    id_eff = identity if norm_bias is None else identity + norm_bias.reshape(1, Co, 1, 1)

    px, Ho, Wo = _im2col(x.astype(compute_dtype), k, padding)
    assert id_eff.shape == (N, Co, Ho, Wo)
    M, K = px.shape
    Kp = _round_up(K, 128)                             # lane-aligned contraction dim
    Cop = _round_up(Co, 128)                           # lane-dense outputs
    TM = max(8, _round_up(min(tm, M), 8))
    Mp = _round_up(M, TM)                              # exact remainder tiles
    grid = (Mp // TM,)

    def pad2(a, rows, cols):
        return jnp.pad(a, ((0, rows - a.shape[0]), (0, cols - a.shape[1])))

    def to_kco(wa):                                    # OIHW -> (Kp, Cop) bf16
        return pad2(wa.reshape(Co, Ci * k * k).T, Kp, Cop).astype(compute_dtype)

    px = pad2(px, Mp, Kp)
    idm = pad2(id_eff.transpose(0, 2, 3, 1).reshape(M, Co).astype(jnp.float32), Mp, Cop)

    out_shape = (jax.ShapeDtypeStruct((Mp, Cop), jnp.float32),
                 jax.ShapeDtypeStruct((Mp, Cop), jnp.float32))
    out_specs = (pl.BlockSpec((TM, Cop), lambda i: (i, 0)),
                 pl.BlockSpec((TM, Cop), lambda i: (i, 0)))
    cparams = pltpu.CompilerParams(
        dimension_semantics=("parallel",),             # megacore sharding on v7x
        vmem_limit_bytes=48 * 1024 * 1024)             # safely under v7x 64 MiB/TC

    if shared_patches:
        if shared_weights:
            wcat = to_kco(w_eff)                       # single matmul, yi == y
        else:
            wcat = jnp.concatenate([to_kco(w_eff), to_kco(w_init)], axis=1)  # (Kp, 2*Cop)
        wcols = wcat.shape[1]
        kern = functools.partial(_shared_patch_kernel, mode=mode, cop=Cop,
                                 shared_w=shared_weights)
        out_x, out_i = pl.pallas_call(
            kern,
            out_shape=out_shape,
            grid=grid,
            in_specs=[pl.BlockSpec((TM, Kp), lambda i: (i, 0)),
                      pl.BlockSpec((Kp, wcols), lambda i: (0, 0)),   # VMEM-resident
                      pl.BlockSpec((TM, Cop), lambda i: (i, 0))],
            out_specs=out_specs,
            compiler_params=cparams,
        )(px, wcat, idm)
    else:
        pi, _, _ = _im2col(x_init.astype(compute_dtype), k, padding)
        pi = pad2(pi, Mp, Kp)
        kern = functools.partial(_two_patch_kernel, mode=mode)
        out_x, out_i = pl.pallas_call(
            kern,
            out_shape=out_shape,
            grid=grid,
            in_specs=[pl.BlockSpec((TM, Kp), lambda i: (i, 0)),
                      pl.BlockSpec((TM, Kp), lambda i: (i, 0)),
                      pl.BlockSpec((Kp, Cop), lambda i: (0, 0)),     # VMEM-resident
                      pl.BlockSpec((Kp, Cop), lambda i: (0, 0)),     # VMEM-resident
                      pl.BlockSpec((TM, Cop), lambda i: (i, 0))],
            out_specs=out_specs,
            compiler_params=cparams,
        )(px, pi, to_kco(w_eff), to_kco(w_init), idm)

    def unpack(o):
        return o[:M, :Co].reshape(N, Ho, Wo, Co).transpose(0, 3, 1, 2)

    return unpack(out_x), unpack(out_i)


def conv_two_stream_residual(x, w, w_init, identity, *, x_init=None,
                             norm_scale=None, norm_bias=None, downsample=None,
                             padding=1, mode=0, tm=512):
    """Pallas forward of ConvTwoStreamResidual (stride=1, bias=False).

    Returns (x_out, x_init_out), both NCHW f32, matching the PyTorch module.
    """
    # TODO(synk): norm_layer / downsample are arbitrary nn.Modules in the spec;
    # here norm_layer is modeled as a per-channel affine (inference BatchNorm
    # folded into weight/identity) and downsample is an optional JAX callable
    # applied to `identity` outside the kernel.
    if downsample is not None:
        identity = downsample(identity)
    if mode == 0:                                      # mode 0 never applies norm_layer
        norm_scale, norm_bias = None, None
    shared_patches = x_init is None
    shared_weights = shared_patches and (w_init is w) and (norm_scale is None)
    return _forward(x, x_init, w, w_init, identity, norm_scale, norm_bias,
                    padding=padding, mode=mode, tm=tm,
                    shared_patches=shared_patches, shared_weights=shared_weights)


# ------------------------------ self-test ---------------------------------- #

def _bf16(a):
    return a.astype(jnp.bfloat16).astype(jnp.float32)


def _conv_ref(xx, ww, pad):
    # Reference on bf16-rounded inputs (the kernel feeds the MXU bf16), f32 accumulate.
    return lax.conv_general_dilated(
        _bf16(xx), _bf16(ww), window_strides=(1, 1),
        padding=[(pad, pad), (pad, pad)],
        dimension_numbers=("NCHW", "OIHW", "NCHW"),
        precision=lax.Precision.HIGHEST)


if __name__ == "__main__":
    key = jax.random.PRNGKey(0)
    ks = jax.random.split(key, 7)

    N, Cin, H, W = 2, 4, 16, 16
    Cout, ksz, pad = 8, 3, 1

    x = jax.random.normal(ks[0], (N, Cin, H, W), jnp.float32)
    x_init_sep = jax.random.normal(ks[1], (N, Cin, H, W), jnp.float32)
    w = jax.random.normal(ks[2], (Cout, Cin, ksz, ksz), jnp.float32) * 0.1
    w_init_free = jax.random.normal(ks[3], (Cout, Cin, ksz, ksz), jnp.float32) * 0.1
    identity = jax.random.normal(ks[4], (N, Cout, H, W), jnp.float32) * 0.1
    nscale = 1.0 + 0.1 * jax.random.normal(ks[5], (Cout,), jnp.float32)
    nbias = 0.1 * jax.random.normal(ks[6], (Cout,), jnp.float32)

    atol = 1e-3

    def check(a, b, name, mask=None):
        err = jnp.abs(a - b)
        if mask is not None:
            err = jnp.where(mask, err, 0.0)            # skip sign-boundary gate ties
        m = float(jnp.max(err))
        assert m < atol, f"{name}: max abs err {m}"

    # mode 0, x_init=None, cloned init weights -> shared-patch + single-matmul path.
    ox0, oi0 = conv_two_stream_residual(x, w, w, identity, padding=pad, mode=0, tm=256)
    jax.block_until_ready((ox0, oi0))
    y0 = _conv_ref(x, w, pad)
    check(ox0, jnp.maximum(y0 + identity, 0.0), "mode0 x")
    check(oi0, jnp.maximum(y0, 0.0), "mode0 x_init")

    # mode 2, x_init=None, independent init weights + affine norm
    # -> shared-patch, concatenated (Kp, 2*Cop) matmul; tm=192 exercises M padding.
    ox2, oi2 = conv_two_stream_residual(
        x, w, w_init_free, identity, norm_scale=nscale, norm_bias=nbias,
        padding=pad, mode=2, tm=192)
    jax.block_until_ready((ox2, oi2))
    yi2 = _conv_ref(x, w_init_free, pad)
    y2 = (_conv_ref(x, w * nscale.reshape(-1, 1, 1, 1), pad)
          + nbias.reshape(1, -1, 1, 1) + identity)
    check(ox2, y2 * (yi2 > 0), "mode2 x", mask=jnp.abs(yi2) > 1e-3)
    check(oi2, jnp.maximum(yi2, 0.0), "mode2 x_init")

    # mode 1, distinct x_init, cloned weights + affine norm -> two-matmul path.
    ox1, oi1 = conv_two_stream_residual(
        x, w, w, identity, x_init=x_init_sep, norm_scale=nscale, norm_bias=nbias,
        padding=pad, mode=1, tm=512)
    jax.block_until_ready((ox1, oi1))
    yi1 = _conv_ref(x_init_sep, w, pad)
    y1 = (_conv_ref(x, w * nscale.reshape(-1, 1, 1, 1), pad)
          + nbias.reshape(1, -1, 1, 1) + identity)
    check(ox1, y1 * (yi1 > 0), "mode1 x", mask=jnp.abs(yi1) > 1e-3)
    check(oi1, jnp.maximum(yi1, 0.0), "mode1 x_init")

    print("KERNEL_OK")
</pallas_src>

<mosaic_0001>
module attributes {stable_mosaic.version = 11 : i64} {
  func.func @_shared_patch_kernel(%arg0: i32, %arg1: memref<256x128xbf16, #tpu.memory_space<vmem>>, %arg2: memref<128x128xbf16, #tpu.memory_space<vmem>>, %arg3: memref<256x128xf32, #tpu.memory_space<vmem>>, %arg4: memref<256x128xf32, #tpu.memory_space<vmem>>, %arg5: memref<256x128xf32, #tpu.memory_space<vmem>>) attributes {dimension_semantics = [#tpu.dimension_semantics<parallel>], iteration_bounds = array<i64: 2>, scalar_prefetch = 0 : i64, scratch_operands = 0 : i64, tpu.core_type = #tpu.core_type<tc>, window_params = [{transform_indices = @transform_0, window_bounds = array<i64: 256, 128>}, {pipeline_mode = #tpu.pipeline_mode<synchronous>, transform_indices = @transform_1, window_bounds = array<i64: 128, 128>}, {transform_indices = @transform_2, window_bounds = array<i64: 256, 128>}, {transform_indices = @transform_3, window_bounds = array<i64: 256, 128>}, {transform_indices = @transform_4, window_bounds = array<i64: 256, 128>}]} {
    %c0 = arith.constant 0 : index
    %c0_0 = arith.constant 0 : index
    %0 = vector.load %arg1[%c0, %c0_0] : memref<256x128xbf16, #tpu.memory_space<vmem>>, vector<256x128xbf16>
    %c0_1 = arith.constant 0 : index
    %c0_2 = arith.constant 0 : index
    %1 = vector.load %arg2[%c0_1, %c0_2] : memref<128x128xbf16, #tpu.memory_space<vmem>>, vector<128x128xbf16>
    %cst = arith.constant dense<0.000000e+00> : vector<256x128xf32>
    %2 = tpu.matmul %0, %1, %cst {dimension_numbers = #tpu.dot_dimension_numbers<[1], [0], [0], [1], [0, 0, 1, 1], [], []>} : vector<256x128xbf16>, vector<128x128xbf16>, vector<256x128xf32> -> vector<256x128xf32>
    %c0_3 = arith.constant 0 : index
    %c0_4 = arith.constant 0 : index
    %3 = vector.load %arg3[%c0_3, %c0_4] : memref<256x128xf32, #tpu.memory_space<vmem>>, vector<256x128xf32>
    %4 = arith.addf %2, %3 : vector<256x128xf32>
    %cst_5 = arith.constant 0.000000e+00 : f32
    %5 = vector.broadcast %cst_5 : f32 to vector<256x128xf32>
    %6 = arith.maximumf %4, %5 : vector<256x128xf32>
    %c0_6 = arith.constant 0 : index
    %c0_7 = arith.constant 0 : index
    %7 = vector.load %arg4[%c0_6, %c0_7] : memref<256x128xf32, #tpu.memory_space<vmem>>, vector<256x128xf32>
    tpu.vector_store %arg4[%c0_6, %c0_7], %6 {strides = array<i32>} : memref<256x128xf32, #tpu.memory_space<vmem>>, vector<256x128xf32>,
    %cst_8 = arith.constant 0.000000e+00 : f32
    %8 = vector.broadcast %cst_8 : f32 to vector<256x128xf32>
    %9 = arith.maximumf %2, %8 : vector<256x128xf32>
    %c0_9 = arith.constant 0 : index
    %c0_10 = arith.constant 0 : index
    %10 = vector.load %arg5[%c0_9, %c0_10] : memref<256x128xf32, #tpu.memory_space<vmem>>, vector<256x128xf32>
    tpu.vector_store %arg5[%c0_9, %c0_10], %9 {strides = array<i32>} : memref<256x128xf32, #tpu.memory_space<vmem>>, vector<256x128xf32>,
    return
  }
  func.func @transform_0(%arg0: i32) -> (i32, i32) {
    %c0_i32 = arith.constant 0 : i32
    %c0_i32_0 = arith.constant 0 : i32
    return %arg0, %c0_i32 : i32, i32
  }
  func.func @transform_1(%arg0: i32) -> (i32, i32) {
    %c0_i32 = arith.constant 0 : i32
    %c0_i32_0 = arith.constant 0 : i32
    %c0_i32_1 = arith.constant 0 : i32
    return %c0_i32, %c0_i32_0 : i32, i32
  }
  func.func @transform_2(%arg0: i32) -> (i32, i32) {
    %c0_i32 = arith.constant 0 : i32
    %c0_i32_0 = arith.constant 0 : i32
    return %arg0, %c0_i32 : i32, i32
  }
  func.func @transform_3(%arg0: i32) -> (i32, i32) {
    %c0_i32 = arith.constant 0 : i32
    %c0_i32_0 = arith.constant 0 : i32
    return %arg0, %c0_i32 : i32, i32
  }
  func.func @transform_4(%arg0: i32) -> (i32, i32) {
    %c0_i32 = arith.constant 0 : i32
    %c0_i32_0 = arith.constant 0 : i32
    return %arg0, %c0_i32 : i32, i32
  }
}

</mosaic_0001>

<bundles_post_ra>
// kernel: _forward.1
= control target key start
LH: loop header
LB: loop body
LE: loop exit
PB: predicated region body
PF: predicated region fallthrough
CT: control target
= control target key end

     0   :  { %s1077_s15 = smov 0   ;;  %s1248_s0 = inlined_call_operand.vmem [shape: bf16[512,128], index: 0, kind: input, shape index: {}]   ;;  %s1249_s1 = inlined_call_operand.vmem [shape: bf16[128,128], index: 1, kind: input, shape index: {}]   ;;  %s1250_s2 = inlined_call_operand.vmem [shape: f32[512,128], index: 2, kind: input, shape index: {}]   ;;  %s1251_s3 = inlined_call_operand.vmem [shape: f32[512,128], index: 3, kind: output, shape index: {0}]   ;;  %s1252_s4 = inlined_call_operand.vmem [shape: f32[512,128], index: 4, kind: output, shape index: {1}]  }
   0x1 LB: > { %s885_s16 = sadd.s32 4294967295, %s1050_s15   ;;  %p889_p0 = scmp.ge.s32.totalorder %s1050_s15, 1  ;;  %s1050_s15 = sphi %s1077_s15, %s15_s15  }
   0x2   : > { %p177_p1 = scmp.lt.s32.totalorder %s1050_s15, 3 }
   0x4   : > { %p178_p2 = pnand %p889_p0, %p177_p1 }
   0x5   : > { %s890_s19 = sshll.u32 (!%p178_p2), %s885_s16, 5 }
   0x6   : > { %181 = sbr.rel (%p178_p2) target bundleno = 273 (0x111), region = 32  ;;  %p214_p3 = scmp.lt.s32.totalorder (!%p178_p2), %s890_s19, 63 }
   0xb   : > { %v1020_v0 = vld [vmem:[%s1249_s1 + $0x38] sm:$0xff]   ;;  %v1021_v1 = vld [vmem:[%s1249_s1 + $0x30] sm:$0xff]   ;;  %s1254_s19 = smov (!%p214_p3, %s890_s19), 63  ;;  %v1022_v2 = vld [vmem:[%s1249_s1 + $0x28] sm:$0xff]  }
   0xc   : > { %948 = vmatprep.subr.bf16.mxu0 %v1020_v0  ;;  %996 = vmatprep.subr.bf16.mxu1 %v1020_v0  ;;  %s891_s24 = sshll.u32 %s1254_s19, 2  ;;  %v1023_v3 = vld [vmem:[%s1249_s1 + $0x20] sm:$0xff]   ;;  %v1024_v6 = vld [vmem:[%s1249_s1 + $0x18] sm:$0xff]   ;;  %v1025_v7 = vld [vmem:[%s1249_s1 + $0x10] sm:$0xff]   ;;  %s893_s12 = sshll.u32 %s1254_s19, 3 }
   0xd   : > { %949 = vmatpush3.bf16.msra.mxu0 %v1020_v0  ;;  %1004 = vmatpush3.bf16.msra.mxu1 %v1020_v0  ;;  %s1100_s27 = scalar_lea.vmem %s1248_s0, %s891_s24  ;;  %v1026_v8 = vld [vmem:[%s1249_s1 + $0x8] sm:$0xff]   ;;  %v1027_v9 = vld [vmem:[%s1249_s1] sm:$0xff]   ;;  %s1137_s16 = scalar_lea.vmem %s1250_s2, %s893_s12 }
   0xe   : > { %950 = vmatprep.subr.bf16.mxu0 %v1021_v1  ;;  %997 = vmatprep.subr.bf16.mxu1 %v1021_v1  ;;  %v1028_v4 = vld [vmem:[%s1100_s27] sm:$0xff]   ;;  %v1030_v10 = vld [vmem:[%s1100_s27 + $0x8] sm:$0xff]   ;;  %v1032_v12 = vld [vmem:[%s1100_s27 + $0x10] sm:$0xff]   ;;  %s1144_s20 = scalar_lea.vmem %s1252_s4, %s893_s12  ;;  %s1151_s22 = scalar_lea.vmem %s1251_s3, %s893_s12 }
   0xf   : > { %v1029_v5 = vld [vmem:[%s1100_s27 + $0x40] sm:$0xff]   ;;  %964 = vmatprep.mubr.bf16.mxu0 %v1028_v4  ;;  %v1031_v11 = vld [vmem:[%s1100_s27 + $0x48] sm:$0xff]   ;;  %v1033_v13 = vld [vmem:[%s1100_s27 + $0x50] sm:$0xff]  }
  0x10   : > { %980 = vmatprep.mubr.bf16.mxu1 %v1029_v5  ;;  %v1034_v14 = vld [vmem:[%s1100_s27 + $0x18] sm:$0xff]   ;;  %v1036_v16 = vld [vmem:[%s1100_s27 + $0x20] sm:$0xff]   ;;  %v1038_v18 = vld [vmem:[%s1100_s27 + $0x28] sm:$0xff]  }
  0x11   : > { %951 = vmatpush3.bf16.msra.mxu0 %v1021_v1  ;;  %1005 = vmatpush3.bf16.msra.mxu1 %v1021_v1  ;;  %v1035_v15 = vld [vmem:[%s1100_s27 + $0x58] sm:$0xff]   ;;  %v1037_v17 = vld [vmem:[%s1100_s27 + $0x60] sm:$0xff]   ;;  %v1039_v19 = vld [vmem:[%s1100_s27 + $0x68] sm:$0xff]  }
  0x12   : > { %952 = vmatprep.subr.bf16.mxu0 %v1022_v2  ;;  %998 = vmatprep.subr.bf16.mxu1 %v1022_v2  ;;  %v1040_v20 = vld [vmem:[%s1100_s27 + $0x30] sm:$0xff]   ;;  %v1042_v22 = vld [vmem:[%s1100_s27 + $0x38] sm:$0xff]   ;;  %v591_v28 = vld [vmem:[%s1137_s16] sm:$0xff] }
  0x13   : > { %v1041_v21 = vld [vmem:[%s1100_s27 + $0x70] sm:$0xff]   ;;  %v1043_v23 = vld [vmem:[%s1100_s27 + $0x78] sm:$0xff]   ;;  %v607_v33 = vld [vmem:[%s1137_s16 + $0x80] sm:$0xff] }
  0x14   : > { %v593_v24 = vld [vmem:[%s1137_s16 + $0x10] sm:$0xff]  ;;  %v594_v36 = vld [vmem:[%s1137_s16 + $0x18] sm:$0xff]  ;;  %v592_v46 = vld [vmem:[%s1137_s16 + $0x8] sm:$0xff] }
  0x15   : > { %953 = vmatpush3.bf16.msra.mxu0 %v1022_v2  ;;  %1006 = vmatpush3.bf16.msra.mxu1 %v1022_v2  ;;  %v609_v25 = vld [vmem:[%s1137_s16 + $0x90] sm:$0xff]  ;;  %v610_v37 = vld [vmem:[%s1137_s16 + $0x98] sm:$0xff]  ;;  %v608_v51 = vld [vmem:[%s1137_s16 + $0x88] sm:$0xff] }
  0x16   : > { %954 = vmatprep.subr.bf16.mxu0 %v1023_v3  ;;  %999 = vmatprep.subr.bf16.mxu1 %v1023_v3  ;;  %v597_v56 = vld [vmem:[%s1137_s16 + $0x30] sm:$0xff]  ;;  %v595_v2 = vld [vmem:[%s1137_s16 + $0x20] sm:$0xff] }
  0x17   : > { %v613_v57 = vld [vmem:[%s1137_s16 + $0xb0] sm:$0xff] }
  0x19   : > { %955 = vmatpush3.bf16.msra.mxu0 %v1023_v3  ;;  %1007 = vmatpush3.bf16.msra.mxu1 %v1023_v3 }
  0x1a   : > { %956 = vmatprep.subr.bf16.mxu0 %v1024_v6  ;;  %1000 = vmatprep.subr.bf16.mxu1 %v1024_v6 }
  0x1d   : > { %957 = vmatpush3.bf16.msra.mxu0 %v1024_v6  ;;  %1008 = vmatpush3.bf16.msra.mxu1 %v1024_v6 }
  0x1e   : > { %958 = vmatprep.subr.bf16.mxu0 %v1025_v7  ;;  %1001 = vmatprep.subr.bf16.mxu1 %v1025_v7 }
  0x21   : > { %959 = vmatpush3.bf16.msra.mxu0 %v1025_v7  ;;  %1009 = vmatpush3.bf16.msra.mxu1 %v1025_v7  ;;  %v611_v7 = vld [vmem:[%s1137_s16 + $0xa0] sm:$0xff] }
  0x22   : > { %960 = vmatprep.subr.bf16.mxu0 %v1026_v8  ;;  %1002 = vmatprep.subr.bf16.mxu1 %v1026_v8 }
  0x25   : > { %961 = vmatpush3.bf16.msra.mxu0 %v1026_v8  ;;  %1010 = vmatpush3.bf16.msra.mxu1 %v1026_v8 }
  0x26   : > { %962 = vmatprep.subr.bf16.mxu0 %v1027_v9  ;;  %1003 = vmatprep.subr.bf16.mxu1 %v1027_v9 }
  0x29   : > { %963 = vmatpush3.bf16.msra.mxu0 %v1027_v9  ;;  %1011 = vmatpush3.bf16.msra.mxu1 %v1027_v9 }
  0x2c   : > { %965 = vmatmul.mubr.bf16.vlgmr.msra.gmra.mxu0 %v1030_v10  ;;  %981 = vmatmul.mubr.bf16.vlgmr.msra.gmra.mxu1 %v1031_v11 }
  0x2d   : > { %968 = vmatprep.mubr.bf16.mxu0 %v1032_v12  ;;  %984 = vmatprep.mubr.bf16.mxu1 %v1033_v13  ;;  %v598_v12 = vld [vmem:[%s1137_s16 + $0x38] sm:$0xff] }
  0x2e   : > { %v614_v13 = vld [vmem:[%s1137_s16 + $0xb8] sm:$0xff] }
  0x34   : > { %969 = vmatmul.mubr.bf16.gmra.mxu0 %v1034_v14  ;;  %985 = vmatmul.mubr.bf16.gmra.mxu1 %v1035_v15 }
  0x35   : > { %972 = vmatprep.mubr.bf16.mxu0 %v1036_v16  ;;  %988 = vmatprep.mubr.bf16.mxu1 %v1037_v17 }
  0x3c   : > { %973 = vmatmul.mubr.bf16.gmra.mxu0 %v1038_v18  ;;  %989 = vmatmul.mubr.bf16.gmra.mxu1 %v1039_v19 }
  0x3d   : > { %976 = vmatprep.mubr.bf16.mxu0 %v1040_v20  ;;  %992 = vmatprep.mubr.bf16.mxu1 %v1041_v21 }
  0x44   : > { %977 = vmatmul.mubr.bf16.gmra.mxu0 %v1042_v22  ;;  %993 = vmatmul.mubr.bf16.gmra.mxu1 %v1043_v23  ;;  %v596_v22 = vld [vmem:[%s1137_s16 + $0x28] sm:$0xff] }
  0xec   : > { %v966_v26 = vpop.f32.mrf.mxu0  ;;  %v982_v27 = vpop.f32.mrf.mxu1 }
  0xed   : > { %v625_v29 = vadd.f32 %v966_v26, %v593_v24  ;;  %v721_v30 = vmax.f32 %v966_v26, 0.0  ;;  %v641_v31 = vadd.f32 %v982_v27, %v609_v25  ;;  %v737_v32 = vmax.f32 %v982_v27, 0.0  ;;  %v612_v27 = vld [vmem:[%s1137_s16 + $0xa8] sm:$0xff] }
  0xee   : > { %v464_v34 = vpop.f32.mrf.mxu0  ;;  %v528_v35 = vpop.f32.mrf.mxu1 }
  0xef   : > { %v657_v38 = vmax.f32 %v625_v29, 0.0  ;;  %753 = vst [vmem:[%s1144_s20 + $0x10] sm:$0xff] %v721_v30  ;;  %v673_v39 = vmax.f32 %v641_v31, 0.0  ;;  %769 = vst [vmem:[%s1144_s20 + $0x90] sm:$0xff] %v737_v32  ;;  %v623_v40 = vadd.f32 %v591_v28, %v464_v34  ;;  %v719_v41 = vmax.f32 %v464_v34, 0.0  ;;  %v601_v32 = vld [vmem:[%s1137_s16 + $0x50] sm:$0xff] }
  0xf0   : > { %v639_v42 = vadd.f32 %v607_v33, %v528_v35  ;;  %v735_v43 = vmax.f32 %v528_v35, 0.0  ;;  %v967_v44 = vpop.f32.mrf.mxu0  ;;  %v983_v45 = vpop.f32.mrf.mxu1  ;;  %v617_v33 = vld [vmem:[%s1137_s16 + $0xd0] sm:$0xff] }
  0xf1   : > { %689 = vst [vmem:[%s1151_s22 + $0x10] sm:$0xff] %v657_v38  ;;  %705 = vst [vmem:[%s1151_s22 + $0x90] sm:$0xff] %v673_v39  ;;  %v655_v47 = vmax.f32 %v623_v40, 0.0  ;;  %v626_v48 = vadd.f32 %v967_v44, %v594_v36  ;;  %v722_v49 = vmax.f32 %v967_v44, 0.0  ;;  %v642_v50 = vadd.f32 %v983_v45, %v610_v37 }
  0xf2   : > { %751 = vst [vmem:[%s1144_s20] sm:$0xff] %v719_v41  ;;  %v671_v52 = vmax.f32 %v639_v42, 0.0  ;;  %767 = vst [vmem:[%s1144_s20 + $0x80] sm:$0xff] %v735_v43  ;;  %v738_v53 = vmax.f32 %v983_v45, 0.0  ;;  %v467_v54 = vpop.f32.mrf.mxu0  ;;  %v531_v55 = vpop.f32.mrf.mxu1  ;;  %v599_v42 = vld [vmem:[%s1137_s16 + $0x40] sm:$0xff] }
  0xf3   : > { %687 = vst [vmem:[%s1151_s22] sm:$0xff] %v655_v47  ;;  %v658_v58 = vmax.f32 %v626_v48, 0.0  ;;  %754 = vst [vmem:[%s1144_s20 + $0x18] sm:$0xff] %v722_v49  ;;  %v674_v59 = vmax.f32 %v642_v50, 0.0  ;;  %v624_v60 = vadd.f32 %v592_v46, %v467_v54  ;;  %v720_v61 = vmax.f32 %v467_v54, 0.0  ;;  %v615_v47 = vld [vmem:[%s1137_s16 + $0xc0] sm:$0xff] }
  0xf4   : > { %703 = vst [vmem:[%s1151_s22 + $0x80] sm:$0xff] %v671_v52  ;;  %770 = vst [vmem:[%s1144_s20 + $0x98] sm:$0xff] %v738_v53  ;;  %v640_v62 = vadd.f32 %v608_v51, %v531_v55  ;;  %v736_v63 = vmax.f32 %v531_v55, 0.0  ;;  %v970_v0 = vpop.f32.mrf.mxu0  ;;  %v986_v1 = vpop.f32.mrf.mxu1  ;;  %v602_v52 = vld [vmem:[%s1137_s16 + $0x58] sm:$0xff] }
  0xf5   : > { %690 = vst [vmem:[%s1151_s22 + $0x18] sm:$0xff] %v658_v58  ;;  %706 = vst [vmem:[%s1151_s22 + $0x98] sm:$0xff] %v674_v59  ;;  %v656_v3 = vmax.f32 %v624_v60, 0.0  ;;  %v629_v4 = vadd.f32 %v970_v0, %v597_v56  ;;  %v725_v5 = vmax.f32 %v970_v0, 0.0  ;;  %v645_v6 = vadd.f32 %v986_v1, %v613_v57  ;;  %v618_v53 = vld [vmem:[%s1137_s16 + $0xd8] sm:$0xff] }
  0xf6   : > { %752 = vst [vmem:[%s1144_s20 + $0x8] sm:$0xff] %v720_v61  ;;  %v672_v8 = vmax.f32 %v640_v62, 0.0  ;;  %768 = vst [vmem:[%s1144_s20 + $0x88] sm:$0xff] %v736_v63  ;;  %v741_v9 = vmax.f32 %v986_v1, 0.0  ;;  %v480_v10 = vpop.f32.mrf.mxu0  ;;  %v544_v11 = vpop.f32.mrf.mxu1  ;;  %v600_v62 = vld [vmem:[%s1137_s16 + $0x48] sm:$0xff] }
  0xf7   : > { %688 = vst [vmem:[%s1151_s22 + $0x8] sm:$0xff] %v656_v3  ;;  %v661_v14 = vmax.f32 %v629_v4, 0.0  ;;  %757 = vst [vmem:[%s1144_s20 + $0x30] sm:$0xff] %v725_v5  ;;  %v677_v15 = vmax.f32 %v645_v6, 0.0  ;;  %v627_v16 = vadd.f32 %v595_v2, %v480_v10  ;;  %v723_v17 = vmax.f32 %v480_v10, 0.0  ;;  %v616_v3 = vld [vmem:[%s1137_s16 + $0xc8] sm:$0xff] }
  0xf8   : > { %704 = vst [vmem:[%s1151_s22 + $0x88] sm:$0xff] %v672_v8  ;;  %773 = vst [vmem:[%s1144_s20 + $0xb0] sm:$0xff] %v741_v9  ;;  %v643_v18 = vadd.f32 %v611_v7, %v544_v11  ;;  %v739_v19 = vmax.f32 %v544_v11, 0.0  ;;  %v971_v20 = vpop.f32.mrf.mxu0  ;;  %v987_v21 = vpop.f32.mrf.mxu1  ;;  %v605_v8 = vld [vmem:[%s1137_s16 + $0x70] sm:$0xff] }
  0xf9   : > { %693 = vst [vmem:[%s1151_s22 + $0x30] sm:$0xff] %v661_v14  ;;  %709 = vst [vmem:[%s1151_s22 + $0xb0] sm:$0xff] %v677_v15  ;;  %v659_v23 = vmax.f32 %v627_v16, 0.0  ;;  %v630_v24 = vadd.f32 %v971_v20, %v598_v12  ;;  %v726_v25 = vmax.f32 %v971_v20, 0.0  ;;  %v646_v26 = vadd.f32 %v987_v21, %v614_v13  ;;  %v621_v9 = vld [vmem:[%s1137_s16 + $0xf0] sm:$0xff] }
  0xfa   : > { %755 = vst [vmem:[%s1144_s20 + $0x20] sm:$0xff] %v723_v17  ;;  %v675_v28 = vmax.f32 %v643_v18, 0.0  ;;  %771 = vst [vmem:[%s1144_s20 + $0xa0] sm:$0xff] %v739_v19  ;;  %v742_v29 = vmax.f32 %v987_v21, 0.0  ;;  %v483_v30 = vpop.f32.mrf.mxu0  ;;  %v547_v31 = vpop.f32.mrf.mxu1  ;;  %v603_v18 = vld [vmem:[%s1137_s16 + $0x60] sm:$0xff] }
  0xfb   : > { %691 = vst [vmem:[%s1151_s22 + $0x20] sm:$0xff] %v659_v23  ;;  %v662_v34 = vmax.f32 %v630_v24, 0.0  ;;  %758 = vst [vmem:[%s1144_s20 + $0x38] sm:$0xff] %v726_v25  ;;  %v678_v35 = vmax.f32 %v646_v26, 0.0  ;;  %v628_v36 = vadd.f32 %v596_v22, %v483_v30  ;;  %v724_v37 = vmax.f32 %v483_v30, 0.0  ;;  %v619_v23 = vld [vmem:[%s1137_s16 + $0xe0] sm:$0xff] }
  0xfc   : > { %707 = vst [vmem:[%s1151_s22 + $0xa0] sm:$0xff] %v675_v28  ;;  %774 = vst [vmem:[%s1144_s20 + $0xb8] sm:$0xff] %v742_v29  ;;  %v644_v38 = vadd.f32 %v612_v27, %v547_v31  ;;  %v740_v39 = vmax.f32 %v547_v31, 0.0  ;;  %v974_v40 = vpop.f32.mrf.mxu0  ;;  %v990_v41 = vpop.f32.mrf.mxu1  ;;  %v606_v28 = vld [vmem:[%s1137_s16 + $0x78] sm:$0xff] }
  0xfd   : > { %694 = vst [vmem:[%s1151_s22 + $0x38] sm:$0xff] %v662_v34  ;;  %710 = vst [vmem:[%s1151_s22 + $0xb8] sm:$0xff] %v678_v35  ;;  %v660_v43 = vmax.f32 %v628_v36, 0.0  ;;  %v633_v44 = vadd.f32 %v974_v40, %v601_v32  ;;  %v729_v45 = vmax.f32 %v974_v40, 0.0  ;;  %v649_v46 = vadd.f32 %v990_v41, %v617_v33  ;;  %v622_v29 = vld [vmem:[%s1137_s16 + $0xf8] sm:$0xff] }
  0xfe   : > { %756 = vst [vmem:[%s1144_s20 + $0x28] sm:$0xff] %v724_v37  ;;  %v676_v48 = vmax.f32 %v644_v38, 0.0  ;;  %772 = vst [vmem:[%s1144_s20 + $0xa8] sm:$0xff] %v740_v39  ;;  %v745_v49 = vmax.f32 %v990_v41, 0.0  ;;  %v496_v50 = vpop.f32.mrf.mxu0  ;;  %v560_v51 = vpop.f32.mrf.mxu1  ;;  %v604_v38 = vld [vmem:[%s1137_s16 + $0x68] sm:$0xff] }
  0xff   : > { %692 = vst [vmem:[%s1151_s22 + $0x28] sm:$0xff] %v660_v43  ;;  %v665_v54 = vmax.f32 %v633_v44, 0.0  ;;  %761 = vst [vmem:[%s1144_s20 + $0x50] sm:$0xff] %v729_v45  ;;  %v681_v55 = vmax.f32 %v649_v46, 0.0  ;;  %v631_v56 = vadd.f32 %v599_v42, %v496_v50  ;;  %v727_v57 = vmax.f32 %v496_v50, 0.0  ;;  %v620_v43 = vld [vmem:[%s1137_s16 + $0xe8] sm:$0xff] }
 0x100   : > { %708 = vst [vmem:[%s1151_s22 + $0xa8] sm:$0xff] %v676_v48  ;;  %777 = vst [vmem:[%s1144_s20 + $0xd0] sm:$0xff] %v745_v49  ;;  %v647_v58 = vadd.f32 %v615_v47, %v560_v51  ;;  %v743_v59 = vmax.f32 %v560_v51, 0.0  ;;  %v975_v60 = vpop.f32.mrf.mxu0  ;;  %v991_v61 = vpop.f32.mrf.mxu1 }
 0x101   : > { %697 = vst [vmem:[%s1151_s22 + $0x50] sm:$0xff] %v665_v54  ;;  %713 = vst [vmem:[%s1151_s22 + $0xd0] sm:$0xff] %v681_v55  ;;  %v663_v63 = vmax.f32 %v631_v56, 0.0  ;;  %v634_v0 = vadd.f32 %v975_v60, %v602_v52  ;;  %v730_v1 = vmax.f32 %v975_v60, 0.0  ;;  %v650_v2 = vadd.f32 %v991_v61, %v618_v53 }
 0x102   : > { %759 = vst [vmem:[%s1144_s20 + $0x40] sm:$0xff] %v727_v57  ;;  %v679_v4 = vmax.f32 %v647_v58, 0.0  ;;  %775 = vst [vmem:[%s1144_s20 + $0xc0] sm:$0xff] %v743_v59  ;;  %v746_v5 = vmax.f32 %v991_v61, 0.0  ;;  %v499_v6 = vpop.f32.mrf.mxu0  ;;  %v563_v7 = vpop.f32.mrf.mxu1 }
 0x103   : > { %695 = vst [vmem:[%s1151_s22 + $0x40] sm:$0xff] %v663_v63  ;;  %v666_v10 = vmax.f32 %v634_v0, 0.0  ;;  %762 = vst [vmem:[%s1144_s20 + $0x58] sm:$0xff] %v730_v1  ;;  %v682_v11 = vmax.f32 %v650_v2, 0.0  ;;  %v632_v12 = vadd.f32 %v600_v62, %v499_v6  ;;  %v728_v13 = vmax.f32 %v499_v6, 0.0 }
 0x104   : > { %711 = vst [vmem:[%s1151_s22 + $0xc0] sm:$0xff] %v679_v4  ;;  %778 = vst [vmem:[%s1144_s20 + $0xd8] sm:$0xff] %v746_v5  ;;  %v648_v14 = vadd.f32 %v616_v3, %v563_v7  ;;  %v744_v15 = vmax.f32 %v563_v7, 0.0  ;;  %v978_v16 = vpop.f32.mrf.mxu0  ;;  %v994_v17 = vpop.f32.mrf.mxu1 }
 0x105   : > { %698 = vst [vmem:[%s1151_s22 + $0x58] sm:$0xff] %v666_v10  ;;  %714 = vst [vmem:[%s1151_s22 + $0xd8] sm:$0xff] %v682_v11  ;;  %v664_v19 = vmax.f32 %v632_v12, 0.0  ;;  %v637_v20 = vadd.f32 %v978_v16, %v605_v8  ;;  %v733_v21 = vmax.f32 %v978_v16, 0.0  ;;  %v653_v22 = vadd.f32 %v994_v17, %v621_v9 }
 0x106   : > { %760 = vst [vmem:[%s1144_s20 + $0x48] sm:$0xff] %v728_v13  ;;  %v680_v24 = vmax.f32 %v648_v14, 0.0  ;;  %776 = vst [vmem:[%s1144_s20 + $0xc8] sm:$0xff] %v744_v15  ;;  %v749_v25 = vmax.f32 %v994_v17, 0.0  ;;  %v512_v26 = vpop.f32.mrf.mxu0  ;;  %v576_v27 = vpop.f32.mrf.mxu1 }
 0x107   : > { %696 = vst [vmem:[%s1151_s22 + $0x48] sm:$0xff] %v664_v19  ;;  %v669_v30 = vmax.f32 %v637_v20, 0.0  ;;  %765 = vst [vmem:[%s1144_s20 + $0x70] sm:$0xff] %v733_v21  ;;  %v685_v31 = vmax.f32 %v653_v22, 0.0  ;;  %v635_v32 = vadd.f32 %v603_v18, %v512_v26  ;;  %v731_v33 = vmax.f32 %v512_v26, 0.0 }
 0x108   : > { %712 = vst [vmem:[%s1151_s22 + $0xc8] sm:$0xff] %v680_v24  ;;  %781 = vst [vmem:[%s1144_s20 + $0xf0] sm:$0xff] %v749_v25  ;;  %v651_v34 = vadd.f32 %v619_v23, %v576_v27  ;;  %v747_v35 = vmax.f32 %v576_v27, 0.0  ;;  %v979_v36 = vpop.f32.mrf.mxu0  ;;  %v995_v37 = vpop.f32.mrf.mxu1 }
 0x109   : > { %701 = vst [vmem:[%s1151_s22 + $0x70] sm:$0xff] %v669_v30  ;;  %717 = vst [vmem:[%s1151_s22 + $0xf0] sm:$0xff] %v685_v31  ;;  %v667_v39 = vmax.f32 %v635_v32, 0.0  ;;  %v638_v40 = vadd.f32 %v979_v36, %v606_v28  ;;  %v734_v41 = vmax.f32 %v979_v36, 0.0  ;;  %v654_v42 = vadd.f32 %v995_v37, %v622_v29 }
 0x10a   : > { %763 = vst [vmem:[%s1144_s20 + $0x60] sm:$0xff] %v731_v33  ;;  %v683_v44 = vmax.f32 %v651_v34, 0.0  ;;  %779 = vst [vmem:[%s1144_s20 + $0xe0] sm:$0xff] %v747_v35  ;;  %v750_v45 = vmax.f32 %v995_v37, 0.0  ;;  %v515_v46 = vpop.f32.mrf.mxu0  ;;  %v579_v47 = vpop.f32.mrf.mxu1 }
 0x10b   : > { %699 = vst [vmem:[%s1151_s22 + $0x60] sm:$0xff] %v667_v39  ;;  %v670_v48 = vmax.f32 %v638_v40, 0.0  ;;  %766 = vst [vmem:[%s1144_s20 + $0x78] sm:$0xff] %v734_v41  ;;  %v686_v49 = vmax.f32 %v654_v42, 0.0  ;;  %v636_v50 = vadd.f32 %v604_v38, %v515_v46  ;;  %v732_v51 = vmax.f32 %v515_v46, 0.0 }
 0x10c   : > { %715 = vst [vmem:[%s1151_s22 + $0xe0] sm:$0xff] %v683_v44  ;;  %782 = vst [vmem:[%s1144_s20 + $0xf8] sm:$0xff] %v750_v45  ;;  %v652_v52 = vadd.f32 %v620_v43, %v579_v47  ;;  %v748_v53 = vmax.f32 %v579_v47, 0.0 }
 0x10d   : > { %702 = vst [vmem:[%s1151_s22 + $0x78] sm:$0xff] %v670_v48  ;;  %718 = vst [vmem:[%s1151_s22 + $0xf8] sm:$0xff] %v686_v49  ;;  %v668_v54 = vmax.f32 %v636_v50, 0.0 }
 0x10e   : > { %764 = vst [vmem:[%s1144_s20 + $0x68] sm:$0xff] %v732_v51  ;;  %v684_v55 = vmax.f32 %v652_v52, 0.0  ;;  %780 = vst [vmem:[%s1144_s20 + $0xe8] sm:$0xff] %v748_v53 }
 0x10f   : > { %700 = vst [vmem:[%s1151_s22 + $0x68] sm:$0xff] %v668_v54 }
 0x110   : > { %716 = vst [vmem:[%s1151_s22 + $0xe8] sm:$0xff] %v684_v55 }
 0x111 PF: > { %s15_s15 = sadd.s32 1, %s1050_s15  }
 0x112   : > { %p12_p4 = scmp.ge.s32.totalorder %s15_s15, 4  }
 0x114   :  { %14 = sbr.rel (!%p12_p4) target bundleno = 1 (0x1), region = 77 }

</bundles_post_ra>
